<compile_context>
chip_gen: v7x
topology: tpu7x:2x2x1
jax: 0.10.0
libtpu: 0.0.40
codegen_flags: <defaults>
</compile_context>

<pallas_src>
import math

import jax
import jax.numpy as jnp
from jax.experimental import pallas as pl
from jax.experimental.pallas import tpu as pltpu

IN_FEATURES = 2
OUT_FEATURES = 26 * 2  # 52
_LANE = 128


def _from2d_kernel(x_ref, w_ref, b_ref, o_ref):
    # x_ref: (2, tB)    activations, batch on the lane axis
    # w_ref: (52, 2)    PyTorch nn.Linear weight layout (out, in)
    # b_ref: (52, 1)    bias as a column
    # o_ref: (52, tB)   output, batch on the lane axis (lane-dense stores)
    x = x_ref[...].astype(jnp.float32)
    w = w_ref[...].astype(jnp.float32)
    b = b_ref[...].astype(jnp.float32)
    # K=2 contraction as two VPU broadcast FMAs (no MXU push/pop latency,
    # exact f32 numerics).
    y = w[:, 0:1] * x[0:1, :] + w[:, 1:2] * x[1:2, :] + b
    o_ref[...] = y.astype(o_ref.dtype)


def _round_up(n, m):
    return ((n + m - 1) // m) * m


def from2d_forward(x, weight, bias, *, block_b=1024, min_pallas_batch=256):
    """Forward pass of From2D.

    Args:
      x: leading batch dim B, 2 total elements per sample (PyTorch does
         x.view(B, 2)).
      weight: (52, 2)  -- PyTorch nn.Linear weight layout (out, in).
      bias:   (52,)
      block_b: batch tile on the lane axis (multiple of 128).
      min_pallas_batch: below this batch size, use plain JAX (launch
         overhead dominates).
    Returns:
      (B, 2, 26) array in x.dtype.
    """
    B = x.shape[0]
    out_dtype = x.dtype
    x2 = x.reshape(B, IN_FEATURES)

    if B < min_pallas_batch:
        # Small-batch escape hatch: a standalone Pallas call is pure overhead.
        y = (x2.astype(jnp.float32) @ weight.T.astype(jnp.float32)
             + bias.astype(jnp.float32))
        return y.astype(out_dtype).reshape(B, 2, 26)

    # Lane-dense transposed layout: batch on the lane (last) axis.
    tB = min(block_b, _round_up(B, _LANE))
    Bp = _round_up(B, tB)
    x_t = x2.T                                    # (2, B)
    if Bp != B:
        x_t = jnp.pad(x_t, ((0, 0), (0, Bp - B)))
    b2 = bias.reshape(OUT_FEATURES, 1)

    grid = (Bp // tB,)
    out_itemsize = jnp.dtype(out_dtype).itemsize
    cost = pl.CostEstimate(
        flops=2 * B * IN_FEATURES * OUT_FEATURES,
        transcendentals=0,
        bytes_accessed=int(
            Bp * IN_FEATURES * x_t.dtype.itemsize
            + Bp * OUT_FEATURES * out_itemsize
            + weight.size * weight.dtype.itemsize
            + bias.size * bias.dtype.itemsize),
    )

    out_t = pl.pallas_call(
        _from2d_kernel,
        out_shape=jax.ShapeDtypeStruct((OUT_FEATURES, Bp), out_dtype),
        grid=grid,
        in_specs=[
            pl.BlockSpec((IN_FEATURES, tB), lambda i: (0, i)),
            pl.BlockSpec((OUT_FEATURES, IN_FEATURES), lambda i: (0, 0)),
            pl.BlockSpec((OUT_FEATURES, 1), lambda i: (0, 0)),
        ],
        out_specs=pl.BlockSpec((OUT_FEATURES, tB), lambda i: (0, i)),
        compiler_params=pltpu.CompilerParams(
            dimension_semantics=("parallel",)),
        cost_estimate=cost,
    )(x_t, weight, b2)

    y = out_t[:, :B].T                            # (B, 52)
    return y.reshape(B, 2, 26)


if __name__ == "__main__":
    key = jax.random.PRNGKey(0)
    kx_small, kx_big, kw, kb = jax.random.split(key, 4)

    # Deterministic parameter init mimicking nn.Linear's default
    # U(-1/sqrt(fan_in), 1/sqrt(fan_in)) with fan_in = 2.
    bound = 1.0 / math.sqrt(IN_FEATURES)
    weight = jax.random.uniform(
        kw, (OUT_FEATURES, IN_FEATURES), jnp.float32, -bound, bound)
    bias = jax.random.uniform(
        kb, (OUT_FEATURES,), jnp.float32, -bound, bound)

    def ref_forward(xin):
        b = xin.shape[0]
        return (xin.reshape(b, IN_FEATURES) @ weight.T + bias).reshape(b, 2, 26)

    # 1) Tiny batch (typical latent usage, B=2): small-batch plain-JAX path.
    x_small = jax.random.normal(kx_small, (2, IN_FEATURES), jnp.float32)
    y_small = jax.block_until_ready(from2d_forward(x_small, weight, bias))
    assert y_small.shape == (2, 2, 26)
    assert jnp.allclose(y_small, ref_forward(x_small), atol=1e-5, rtol=1e-5)

    # 2) Larger batch: exercises the Pallas lane-dense tiled kernel with a
    #    multi-step grid and lane padding (300 is not a multiple of 128).
    B_big = 300
    x_big = jax.random.normal(kx_big, (B_big, IN_FEATURES), jnp.float32)
    y_big = jax.block_until_ready(
        from2d_forward(x_big, weight, bias, block_b=256))
    assert y_big.shape == (B_big, 2, 26)
    assert jnp.allclose(y_big, ref_forward(x_big), atol=1e-5, rtol=1e-5)

    print("KERNEL_OK")
</pallas_src>

<mosaic_0001>
module attributes {stable_mosaic.version = 11 : i64} {
  func.func @_from2d_kernel(%arg0: i32, %arg1: memref<2x256xf32, #tpu.memory_space<vmem>>, %arg2: memref<52x2xf32, #tpu.memory_space<vmem>>, %arg3: memref<52x1xf32, #tpu.memory_space<vmem>>, %arg4: memref<52x256xf32, #tpu.memory_space<vmem>>) attributes {dimension_semantics = [#tpu.dimension_semantics<parallel>], iteration_bounds = array<i64: 2>, scalar_prefetch = 0 : i64, scratch_operands = 0 : i64, tpu.core_type = #tpu.core_type<tc>, window_params = [{transform_indices = @transform_0, window_bounds = array<i64: 2, 256>}, {pipeline_mode = #tpu.pipeline_mode<synchronous>, transform_indices = @transform_1, window_bounds = array<i64: 52, 2>}, {pipeline_mode = #tpu.pipeline_mode<synchronous>, transform_indices = @transform_2, window_bounds = array<i64: 52, 1>}, {transform_indices = @transform_3, window_bounds = array<i64: 52, 256>}]} {
    %c0 = arith.constant 0 : index
    %c0_0 = arith.constant 0 : index
    %0 = vector.load %arg1[%c0, %c0_0] : memref<2x256xf32, #tpu.memory_space<vmem>>, vector<2x256xf32>
    %c0_1 = arith.constant 0 : index
    %c0_2 = arith.constant 0 : index
    %1 = vector.load %arg2[%c0_1, %c0_2] : memref<52x2xf32, #tpu.memory_space<vmem>>, vector<52x2xf32>
    %c0_3 = arith.constant 0 : index
    %c0_4 = arith.constant 0 : index
    %2 = vector.load %arg3[%c0_3, %c0_4] : memref<52x1xf32, #tpu.memory_space<vmem>>, vector<52x1xf32>
    %3 = vector.extract_strided_slice %1 {offsets = [0, 0], sizes = [52, 1], strides = [1, 1]} : vector<52x2xf32> to vector<52x1xf32>
    %4 = vector.extract_strided_slice %0 {offsets = [0, 0], sizes = [1, 256], strides = [1, 1]} : vector<2x256xf32> to vector<1x256xf32>
    %5 = vector.broadcast %3 : vector<52x1xf32> to vector<52x256xf32>
    %6 = vector.broadcast %4 : vector<1x256xf32> to vector<52x256xf32>
    %7 = arith.mulf %5, %6 : vector<52x256xf32>
    %8 = vector.extract_strided_slice %1 {offsets = [0, 1], sizes = [52, 1], strides = [1, 1]} : vector<52x2xf32> to vector<52x1xf32>
    %9 = vector.extract_strided_slice %0 {offsets = [1, 0], sizes = [1, 256], strides = [1, 1]} : vector<2x256xf32> to vector<1x256xf32>
    %10 = vector.broadcast %8 : vector<52x1xf32> to vector<52x256xf32>
    %11 = vector.broadcast %9 : vector<1x256xf32> to vector<52x256xf32>
    %12 = arith.mulf %10, %11 : vector<52x256xf32>
    %13 = arith.addf %7, %12 : vector<52x256xf32>
    %14 = vector.broadcast %2 : vector<52x1xf32> to vector<52x256xf32>
    %15 = arith.addf %13, %14 : vector<52x256xf32>
    %c0_5 = arith.constant 0 : index
    %c0_6 = arith.constant 0 : index
    %16 = vector.load %arg4[%c0_5, %c0_6] : memref<52x256xf32, #tpu.memory_space<vmem>>, vector<52x256xf32>
    tpu.vector_store %arg4[%c0_5, %c0_6], %15 {strides = array<i32>} : memref<52x256xf32, #tpu.memory_space<vmem>>, vector<52x256xf32>,
    return
  }
  func.func @transform_0(%arg0: i32) -> (i32, i32) {
    %c0_i32 = arith.constant 0 : i32
    %c0_i32_0 = arith.constant 0 : i32
    return %c0_i32, %arg0 : i32, i32
  }
  func.func @transform_1(%arg0: i32) -> (i32, i32) {
    %c0_i32 = arith.constant 0 : i32
    %c0_i32_0 = arith.constant 0 : i32
    %c0_i32_1 = arith.constant 0 : i32
    return %c0_i32, %c0_i32_0 : i32, i32
  }
  func.func @transform_2(%arg0: i32) -> (i32, i32) {
    %c0_i32 = arith.constant 0 : i32
    %c0_i32_0 = arith.constant 0 : i32
    %c0_i32_1 = arith.constant 0 : i32
    return %c0_i32, %c0_i32_0 : i32, i32
  }
  func.func @transform_3(%arg0: i32) -> (i32, i32) {
    %c0_i32 = arith.constant 0 : i32
    %c0_i32_0 = arith.constant 0 : i32
    return %c0_i32, %arg0 : i32, i32
  }
}

</mosaic_0001>

<bundles_post_ra>
// kernel: tpu_custom_call.1
= control target key start
LH: loop header
LB: loop body
LE: loop exit
PB: predicated region body
PF: predicated region fallthrough
CT: control target
= control target key end

     0   :  { %8 = vsyncpa [#allocation3], 0  ;;  %s814_s0 = inlined_call_operand.vmem [shape: f32[2,512], index: 0, kind: input, shape index: {}]   ;;  %s815_s1 = inlined_call_operand.vmem [shape: f32[52,2], index: 1, kind: input, shape index: {}]   ;;  %s816_s2 = inlined_call_operand.vmem [shape: f32[52,1], index: 2, kind: input, shape index: {}]   ;;  %s817_s3 = inlined_call_operand.hbm [shape: f32[52,512], index: 3, kind: output, shape index: {}]  }
   0x1   :  { %10 = vsyncpa [#allocation3 + $0x1], 0  ;;  %s619_s12 = smov 0   ;;  %s621_s13 = smov 0  }
   0x2   :  { %s623_s14 = smov 0   ;;  %s625_s15 = smov 0  }
   0x3 LB: > { %s640_s16 = sadd.s32 4294967295, %s591_s15   ;;  %s468_s17 = sadd.s32 4294967294, %s591_s15   ;;  %s591_s15 = sphi %s625_s15, %s823_s15   ;;  %s587_s14 = sphi %s623_s14, %s822_s14   ;;  %s583_s13 = sphi %s621_s13, %s821_s13   ;;  %s579_s12 = sphi %s619_s12, %s820_s12  }
   0x4   : > { %s644_s18 = sadd.s32 1, %s591_s15   ;;  %s91_s19 = sadd.s32 1, %s587_s14 }
   0x5   : > { %s88_s20 = ssub.s32 %s591_s15, %s644_s18  ;;  %p101_p0 = scmp.ne.s32.totalorder %s587_s14, %s583_s13 }
   0x6   : > { %p89_p1 = scmp.eq.s32.totalorder %s88_s20, 0  ;;  %p102_p2 = scmp.eq.s32.totalorder %s640_s16, 1 }
   0x7   : > { %p107_p3 = scmp.ne.s32.totalorder %s583_s13, %s579_s12  ;;  %p108_p4 = scmp.eq.s32.totalorder %s468_s17, 1 }
   0x8   : > { %s655_s21 = scalar_select %p89_p1, %s587_s14, %s91_s19  }
   0x9   : > { %p657_p5 = por %p102_p2, %p101_p0  ;;  %p661_p6 = por %p108_p4, %p107_p3 }
   0xa   : > { %p471_p7 = scmp.ge.s32.totalorder %s591_s15, 1  ;;  %p141_p8 = scmp.lt.s32.totalorder %s591_s15, 3 }
   0xc   : > { %p142_p9 = pnand %p471_p7, %p141_p8 }
   0xd   : > { %v175_v0 = vld [vmem:[%s815_s1 + $0x10] sm:$0xff] (!%p142_p9)  ;;  %v174_v1 = vld [vmem:[%s815_s1 + $0x8] sm:$0xff] (!%p142_p9)  ;;  %v593_v2 = vmov (!%p142_p9), 1   ;;  %v594_v3 = vmov (!%p142_p9), 0   ;;  %v176_v4 = vld [vmem:[%s815_s1 + $0x18] sm:$0xff] (!%p142_p9)  ;;  %s472_s7 = sshll.u32 (!%p142_p9), %s640_s16, 1  ;;  %v223_v20 = vlaneseq (!%p142_p9) }
   0xe   : > { %145 = sbr.rel (%p142_p9) target bundleno = 203 (0xcb), region = 32  ;;  %526 = vset.pattern.permute.xlu0 (!%p142_p9), %v593_v2  ;;  %524 = vset.pattern.permute.xlu1 (!%p142_p9), %v594_v3  ;;  %v177_v5 = vld [vmem:[%s815_s1 + $0x20] sm:$0xff] (!%p142_p9)  ;;  %v178_v6 = vld [vmem:[%s815_s1 + $0x28] sm:$0xff] (!%p142_p9)  ;;  %v179_v7 = vld [vmem:[%s815_s1 + $0x30] sm:$0xf] (!%p142_p9)  ;;  %p166_p10 = scmp.lt.s32.totalorder (!%p142_p9), %s472_s7, 3 }
   0xf   : > { %199 = vperm.xlu1 (!%p142_p9), %524, %v175_v0   ;;  %260 = vperm.xlu0 (!%p142_p9), %526, %v174_v1   ;;  %v173_v8 = vld [vmem:[%s815_s1] sm:$0xff] (!%p142_p9)  ;;  %v181_v9 = vld [vmem:[%s816_s2 + $0x8] sm:$0xff] (!%p142_p9)  ;;  %v182_v12 = vld [vmem:[%s816_s2 + $0x10] sm:$0xff] (!%p142_p9)  ;;  %v224_v23 = vshrl.u32 (!%p142_p9), %v223_v20, 7  ;;  %s162_s17 = sand.u32 (!%p142_p9), 1, %s583_s13   ;;  %s478_s24 = sshll.u32 (!%p142_p9), %s640_s16, 8 }
  0x10   : > { %v180_v10 = vld [vmem:[%s816_s2] sm:$0xff] (!%p142_p9)  ;;  %v186_v13 = vld [vmem:[%s816_s2 + $0x30] sm:$0xf] (!%p142_p9)  ;;  %v183_v14 = vld [vmem:[%s816_s2 + $0x18] sm:$0xff] (!%p142_p9)  ;;  %s479_s19 = smul.u32 (!%p142_p9), 112, %s162_s17  ;;  %s765_s27 = scalar_lea.hbm (!%p142_p9), %s817_s3, %s478_s24 }
  0x11   : > { %v184_v11 = vld [vmem:[%s816_s2 + $0x20] sm:$0xff] (!%p142_p9)  ;;  %v185_v15 = vld [vmem:[%s816_s2 + $0x28] sm:$0xff] (!%p142_p9)  ;;  %v225_v26 = vsub.s32 (!%p142_p9), 0, %v224_v23  ;;  %v229_v27 = vsub.s32 (!%p142_p9), 2, %v224_v23  ;;  %v285_v28 = vsub.s32 (!%p142_p9), 1, %v224_v23  ;;  %v289_v29 = vsub.s32 (!%p142_p9), 3, %v224_v23 }
  0x12   : > { %s736_s20 = scalar_lea.vmem (!%p142_p9), [#allocation2], %s479_s19  ;;  %s773_s28 = scalar_lea.sflag (!%p142_p9), [#allocation3], %s162_s17 }
  0x13   : > { %204 = vperm.xlu1 (!%p142_p9), %524, %v176_v4   ;;  %272 = vperm.xlu0 (!%p142_p9), %526, %v177_v5   ;;  %s406_s25 = sshll.u32 (!%p142_p9), %s736_s20, 4  ;;  %s595_s30 = smov (!%p142_p9), [#allocation2]   ;;  %s767_s25 = int_to_ptr.vmem [resolvable:$true] %s406_s25 }
  0x14   : > { %s529_s29 = scalar_lea.vmem (!%p142_p9), %s767_s25, 1792  ;;  %s533_s4 = sshll.u32 (!%p142_p9), %s595_s30, 4  ;;  %s534_s4 = int_to_ptr.vmem [resolvable:$false] %s533_s4 }
  0x15   : > { %s825_s7 = smov (!%p166_p10, %s472_s7), 3  ;;  %p530_p11 = scmp.ne.s32.totalorder %s767_s25, %s529_s29 }
  0x16   : > { %s473_s8 = sshll.u32 %s825_s7, 1  ;;  %s535_s5 = scalar_lea.vmem %s534_s4, 3584 }
  0x17   : > { %214 = vperm.xlu1 %524, %v178_v6   ;;  %280 = vperm.xlu0 %526, %v179_v7   ;;  %s169_s11 = scalar_lea.vmem %s814_s0, %s473_s8  ;;  %p531_p12 = pnand %p530_p11, %p657_p5 }
  0x18   : > { %v172_v30 = vld [vmem:[%s169_s11] sm:$0xf]  ;;  %p536_p0 = scmp.lt.s32.totalorder %s767_s25, %s534_s4  ;;  %p537_p1 = scmp.lt.s32.totalorder %s535_s5, %s529_s29 }
  0x19   : > { %v226_v33 = vrot.slane %v172_v30, %v225_v26  ;;  %v230_v34 = vrot.slane %v172_v30, %v229_v27  ;;  %v286_v35 = vrot.slane %v172_v30, %v285_v28  ;;  %v290_v36 = vrot.slane %v172_v30, %v289_v29  ;;  %p532_p13 = pneg %p531_p12 }
  0x1a   : > { %p538_p2 = por %p537_p1, %p536_p0 }
  0x1b   : > { %525 = vset.pattern.permute.xlu1 %v593_v2  ;;  %527 = vset.pattern.permute.xlu0 %v594_v3  ;;  %v719_v39 = vrot.slane %v226_v33, %v225_v26  ;;  %v721_v40 = vrot.slane %v230_v34, %v225_v26  ;;  %v296_v41 = vrot.slane %v286_v35, %v285_v28 }
  0x1c   : > { %189 = vperm.xlu0 %527, %v173_v8   ;;  %256 = vperm.xlu1 %525, %v173_v8   ;;  %v300_v42 = vrot.slane %v290_v36, %v285_v28  ;;  %p539_p3 = pnand %p538_p2, %p532_p13 }
  0x20   : > { %194 = vperm.xlu0 %527, %v174_v1   ;;  %264 = vperm.xlu1 %525, %v175_v0  }
  0x24   : > { %209 = vperm.xlu0 %527, %v177_v5   ;;  %268 = vperm.xlu1 %525, %v176_v4  }
  0x28   : > { %219 = vperm.xlu0 %527, %v179_v7   ;;  %276 = vperm.xlu1 %525, %v178_v6  }
  0x2c   : > { %336 = vperm.xlu0 %527, %v181_v9   ;;  %528 = vset.pattern.permute.xlu1 %v594_v3 }
  0x2d   : > { %331 = vperm.xlu1 %528, %v180_v10  }
  0x30   : > { %351 = vperm.xlu0 %527, %v184_v11  }
  0x31   : > { %341 = vperm.xlu1 %528, %v182_v12  }
  0x34   : > { %361 = vperm.xlu0 %527, %v186_v13  }
  0x35   : > { %346 = vperm.xlu1 %528, %v183_v14  }
  0x39   : > { %356 = vperm.xlu1 %528, %v185_v15  }
  0x8e   : > { %v200_v16 = vpop.permute.xlu1 %199  ;;  %v261_v17 = vpop.permute.xlu0 %260 }
  0x8f   : > { %v303_v51 = vmul.f32 %v296_v41, %v261_v17  ;;  %v304_v52 = vmul.f32 %v300_v42, %v261_v17  ;;  %v245_v3 = vmul.f32 %v719_v39, %v200_v16  ;;  %v246_v4 = vmul.f32 %v721_v40, %v200_v16 }
  0x92   : > { %v710_v18 = vpop.permute.xlu1 %204  ;;  %v273_v19 = vpop.permute.xlu0 %272 }
  0x93   : > { %v309_v62 = vmul.f32 %v296_v41, %v273_v19  ;;  %v310_v63 = vmul.f32 %v300_v42, %v273_v19 }
  0x96   : > { %v712_v21 = vpop.permute.xlu1 %214  ;;  %v714_v22 = vpop.permute.xlu0 %280 }
  0x97   : > { %v313_v16 = vmul.f32 %v296_v41, %v714_v22  ;;  %v314_v17 = vmul.f32 %v300_v42, %v714_v22  ;;  %v251_v36 = vmul.f32 %v719_v39, %v712_v21 }
  0x9b   : > { %v190_v24 = vpop.permute.xlu0 %189  ;;  %v257_v25 = vpop.permute.xlu1 %256 }
  0x9c   : > { %v241_v45 = vmul.f32 %v719_v39, %v190_v24  ;;  %v242_v46 = vmul.f32 %v721_v40, %v190_v24  ;;  %v301_v47 = vmul.f32 %v296_v41, %v257_v25  ;;  %v302_v48 = vmul.f32 %v300_v42, %v257_v25 }
  0x9d   : > { %v247_v24 = vmul.f32 %v719_v39, %v710_v18  ;;  %v248_v25 = vmul.f32 %v721_v40, %v710_v18 }
  0x9e   : > { %v315_v60 = vadd.f32 %v301_v47, %v241_v45  ;;  %v316_v61 = vadd.f32 %v302_v48, %v242_v46 }
  0x9f   : > { %v195_v31 = vpop.permute.xlu0 %194  ;;  %v265_v32 = vpop.permute.xlu1 %264 }
  0xa0   : > { %v243_v43 = vmul.f32 %v719_v39, %v195_v31  ;;  %v244_v44 = vmul.f32 %v721_v40, %v195_v31  ;;  %v305_v57 = vmul.f32 %v296_v41, %v265_v32  ;;  %v306_v58 = vmul.f32 %v300_v42, %v265_v32 }
  0xa2   : > { %v317_v55 = vadd.f32 %v303_v51, %v243_v43  ;;  %v318_v56 = vadd.f32 %v304_v52, %v244_v44  ;;  %v319_v14 = vadd.f32 %v305_v57, %v245_v3  ;;  %v320_v15 = vadd.f32 %v306_v58, %v246_v4 }
  0xa3   : > { %v210_v37 = vpop.permute.xlu0 %209  ;;  %v269_v38 = vpop.permute.xlu1 %268 }
  0xa4   : > { %v249_v53 = vmul.f32 %v719_v39, %v210_v37  ;;  %v250_v54 = vmul.f32 %v721_v40, %v210_v37  ;;  %v307_v11 = vmul.f32 %v296_v41, %v269_v38  ;;  %v308_v12 = vmul.f32 %v300_v42, %v269_v38 }
  0xa5   : > { %v252_v37 = vmul.f32 %v721_v40, %v712_v21 }
  0xa6   : > { %v323_v9 = vadd.f32 %v309_v62, %v249_v53  ;;  %v324_v10 = vadd.f32 %v310_v63, %v250_v54  ;;  %v321_v32 = vadd.f32 %v307_v11, %v247_v24  ;;  %v322_v33 = vadd.f32 %v308_v12, %v248_v25 }
  0xa7   : > { %v220_v49 = vpop.permute.xlu0 %219  ;;  %v277_v50 = vpop.permute.xlu1 %276 }
  0xa8   : > { %v253_v7 = vmul.f32 %v719_v39, %v220_v49  ;;  %v254_v8 = vmul.f32 %v721_v40, %v220_v49  ;;  %v311_v30 = vmul.f32 %v296_v41, %v277_v50  ;;  %v312_v22 = vmul.f32 %v300_v42, %v277_v50 }
  0xaa   : > { %v327_v28 = vadd.f32 %v313_v16, %v253_v7  ;;  %v328_v29 = vadd.f32 %v314_v17, %v254_v8  ;;  %v325_v42 = vadd.f32 %v311_v30, %v251_v36  ;;  %v326_v43 = vadd.f32 %v312_v22, %v252_v37 }
  0xab   : > { %v337_v59 = vpop.permute.xlu0 %336 }
  0xac   : > { %v366_v0 = vadd.f32 %v337_v59, %v317_v55  ;;  %v367_v1 = vadd.f32 %v337_v59, %v318_v56  ;;  %v332_v2 = vpop.permute.xlu1 %331 }
  0xad   : > { %v364_v5 = vadd.f32 %v332_v2, %v315_v60  ;;  %v365_v6 = vadd.f32 %v332_v2, %v316_v61 }
  0xae   : > { %380 = vst [vmem:[%s736_s20 + $0x10] sm:$0xff] %v366_v0  ;;  %381 = vst [vmem:[%s736_s20 + $0x18] sm:$0xff] %v367_v1 }
  0xaf   : > { %378 = vst [vmem:[%s736_s20] sm:$0xff] %v364_v5  ;;  %379 = vst [vmem:[%s736_s20 + $0x8] sm:$0xff] %v365_v6  ;;  %v352_v13 = vpop.permute.xlu0 %351 }
  0xb0   : > { %v372_v19 = vadd.f32 %v352_v13, %v323_v9  ;;  %v373_v20 = vadd.f32 %v352_v13, %v324_v10  ;;  %v342_v23 = vpop.permute.xlu1 %341 }
  0xb1   : > { %v368_v26 = vadd.f32 %v342_v23, %v319_v14  ;;  %v369_v27 = vadd.f32 %v342_v23, %v320_v15 }
  0xb2   : > { %386 = vst [vmem:[%s736_s20 + $0x40] sm:$0xff] %v372_v19  ;;  %387 = vst [vmem:[%s736_s20 + $0x48] sm:$0xff] %v373_v20 }
  0xb3   : > { %382 = vst [vmem:[%s736_s20 + $0x20] sm:$0xff] %v368_v26  ;;  %383 = vst [vmem:[%s736_s20 + $0x28] sm:$0xff] %v369_v27  ;;  %v362_v31 = vpop.permute.xlu0 %361 }
  0xb4   : > { %v376_v18 = vadd.f32 %v362_v31, %v327_v28  ;;  %v377_v34 = vadd.f32 %v362_v31, %v328_v29  ;;  %v347_v35 = vpop.permute.xlu1 %346 }
  0xb5   : > { %v370_v38 = vadd.f32 %v347_v35, %v321_v32  ;;  %v371_v41 = vadd.f32 %v347_v35, %v322_v33 }
  0xb6   : > { %390 = vst [vmem:[%s736_s20 + $0x60] sm:$0xf] %v376_v18  ;;  %391 = vst [vmem:[%s736_s20 + $0x68] sm:$0xf] %v377_v34 }
  0xb7   : > { %384 = vst [vmem:[%s736_s20 + $0x30] sm:$0xff] %v370_v38  ;;  %385 = vst [vmem:[%s736_s20 + $0x38] sm:$0xff] %v371_v41 }
  0xb8   : > { %v357_v39 = vpop.permute.xlu1 %356 }
  0xb9   : > { %v374_v21 = vadd.f32 %v357_v39, %v325_v42  ;;  %v375_v40 = vadd.f32 %v357_v39, %v326_v43 }
  0xbb   : > { %388 = vst [vmem:[%s736_s20 + $0x50] sm:$0xff] %v374_v21  ;;  %389 = vst [vmem:[%s736_s20 + $0x58] sm:$0xff] %v375_v40 }
  0xbc   : > { %542 = shalt.err (!%p539_p3)
}
  0xbd   : > { %s543_s6 = scalar_lea.hbm %s765_s27, 1792  ;;  %s547_s9 = scalar_lea.hbm %s817_s3, 3584 }
  0xbe   : > { %p544_p4 = scmp.ne.s32.totalorder %s765_s27, %s543_s6  ;;  %p548_p9 = scmp.lt.u32.totalorder %s765_s27, %s817_s3 }
  0xbf   : > { %p549_p10 = scmp.lt.u32.totalorder %s547_s9, %s543_s6  ;;  %p551_p12 = scmp.lt.u32.totalorder %s543_s6, %s765_s27 }
  0xc0   : > { %p545_p7 = pnand %p544_p4, %p657_p5 }
  0xc1   : > { %p550_p11 = por %p549_p10, %p548_p9 }
  0xc2   : > { %p546_p8 = pneg %p545_p7 }
  0xc3   : > { %p552_p13 = por %p551_p12, %p550_p11 }
  0xc5   : > { %p553_p0 = pnand %p552_p13, %p546_p8 }
  0xc7   : > { %556 = shalt.err (!%p553_p0)
}
  0xc8   : > { %s596_s17 = smov 256   ;;  %s597_s19 = smov 512  }
  0xc9   : > { %s598_s20 = smov 16  }
  0xca   : > { %480 = dma.vmem_to_hbm [thread:$0]  (%p657_p5), %s767_s25, 1792, %s765_s27, %s773_s28, %s596_s17, %s597_s19, %s598_s20  }
  0xcb PF: > { %p486_p1 = scmp.ge.s32.totalorder %s591_s15, 2  ;;  %s421_s24 = sand.u32 1, %s579_s12  }
  0xcc   : > { %s422_s16 = scalar_lea.sflag [#allocation3], %s421_s24 }
  0xcd   : > { %p483_p2 = pnand %p486_p1, %p661_p6 }
  0xcf   : > { %574 = dma.done.wait (!%p483_p2), %s422_s16, 1792  }
  0xd0   : > { %576 = vsyncadd (!%p483_p2), %s422_s16, 4294965504  ;;  %p13_p3 = scmp.ge.s32.totalorder %s644_s18, 4   ;;  %s820_s12 = smov %s583_s13 }
  0xd1   : > { %s821_s13 = smov %s587_s14  ;;  %s822_s14 = smov %s655_s21 }
  0xd2   : > { %s823_s15 = smov %s644_s18  ;;  %15 = sbr.rel (!%p13_p3) target bundleno = 3 (0x3), region = 67 }
  0xd9   :  { %427 = vsyncpa [#allocation3], 1 }
  0xda   :  { %429 = vsyncpa [#allocation3 + $0x1], 1 }

</bundles_post_ra>
